<compile_context>
chip_gen: v6e
topology: v6e:2x2x1
jax: 0.10.0
libtpu: 0.0.40
codegen_flags: <defaults>
</compile_context>

<pallas_src>
import functools

import jax
import jax.numpy as jnp
from jax import lax
from jax.experimental import pallas as pl
from jax.experimental.pallas import tpu as pltpu

KSZ = 3          # kernel size (3x3x3); `dilation` is never passed to Conv3d.
BN_EPS = 1e-5


# ----------------------------------------------------------------------------
# Pass 1: one MXU matmul per tile + per-tile BN partial statistics.
# ----------------------------------------------------------------------------
def _conv_stats_kernel(p_ref, w_ref, y_ref, sum_ref, ssq_ref):
    # p_ref:   (K, TILE_M)    bf16  im2col patches (lane axis = flattened NDHW)
    # w_ref:   (Cout, K)      bf16  flattened conv weights
    # y_ref:   (Cout, TILE_M) f32   conv output tile (lane-dense store)
    # sum_ref: (1, Cout, 1)   f32   per-tile per-channel sum
    # ssq_ref: (1, Cout, 1)   f32   per-tile per-channel sum of squares
    acc = jnp.dot(w_ref[...], p_ref[...], preferred_element_type=jnp.float32)
    y_ref[...] = acc
    sum_ref[0] = jnp.sum(acc, axis=1, keepdims=True)
    ssq_ref[0] = jnp.sum(acc * acc, axis=1, keepdims=True)


# ----------------------------------------------------------------------------
# Pass 2: fused BN affine (global batch stats) + activation, lane-dense.
# ----------------------------------------------------------------------------
def _bn_act_kernel(y_ref, scale_ref, shift_ref, o_ref, *, activation):
    z = y_ref[...] * scale_ref[...] + shift_ref[...]
    if activation == "relu":
        z = jnp.maximum(z, 0.0)
    elif activation == "sigmoid":
        z = jax.nn.sigmoid(z)
    # "none": identity (intent of RegularConv(activation='None')).
    o_ref[...] = z


def _pick_tile(m, max_tile):
    """Largest multiple of 128 that divides m and is <= max_tile; else m."""
    best = None
    t = 128
    while t <= min(m, max_tile):
        if m % t == 0:
            best = t
        t += 128
    return best if best is not None else m


def conv3d_bn_act_forward(x_ncdhw, w_oidhw, gamma, beta, activation="relu"):
    """Conv3d(k=3, s=1, p=1, no bias) + BatchNorm3d(train) + activation."""
    assert activation in ("relu", "sigmoid", "none", "None", None)
    N, Cin, D, H, W = x_ncdhw.shape
    Cout = w_oidhw.shape[0]
    # BatchNorm3d(in_channel) on the conv output requires Cout == Cin.
    assert Cout == Cin, "BatchNorm3d(in_channel) requires out_channels == in_channel"
    K = KSZ * KSZ * KSZ * Cin
    M = N * D * H * W

    # ---- wrapper glue: layout + transposed im2col (lane axis = M) ----------
    x_ndhwc = jnp.transpose(x_ncdhw, (0, 2, 3, 4, 1)).astype(jnp.float32)
    x_pad = jnp.pad(x_ndhwc, ((0, 0), (1, 1), (1, 1), (1, 1), (0, 0)))
    taps = [x_pad[:, kd:kd + D, kh:kh + H, kw:kw + W, :]
            for kd in range(KSZ) for kh in range(KSZ) for kw in range(KSZ)]
    p_t = jnp.moveaxis(jnp.stack(taps, axis=0), 5, 1)        # (27, Cin, N, D, H, W)
    p_t = p_t.reshape(K, M).astype(jnp.bfloat16)             # (K, M)   bf16 MXU input
    w_t = jnp.transpose(w_oidhw, (0, 2, 3, 4, 1)).reshape(Cout, K).astype(jnp.bfloat16)

    # ---- pass 1: gridded conv tiles + per-tile BN partial sums -------------
    tile_m = _pick_tile(M, 512)                              # 256–512 rows/tile
    n_tiles = M // tile_m
    cost1 = pl.CostEstimate(
        flops=2 * Cout * K * M, transcendentals=0,
        bytes_accessed=K * M * 2 + Cout * K * 2 + Cout * M * 4 + 8 * n_tiles * Cout)
    conv_t, psum, pssq = pl.pallas_call(
        _conv_stats_kernel,
        grid=(n_tiles,),
        in_specs=[
            pl.BlockSpec((K, tile_m), lambda i: (0, i)),     # patches (lane-dense)
            pl.BlockSpec((Cout, K), lambda i: (0, 0)),       # weights (resident)
        ],
        out_specs=(
            pl.BlockSpec((Cout, tile_m), lambda i: (0, i)),  # conv tile (lane-dense)
            pl.BlockSpec((1, Cout, 1), lambda i: (i, 0, 0)),
            pl.BlockSpec((1, Cout, 1), lambda i: (i, 0, 0)),
        ),
        out_shape=(
            jax.ShapeDtypeStruct((Cout, M), jnp.float32),
            jax.ShapeDtypeStruct((n_tiles, Cout, 1), jnp.float32),
            jax.ShapeDtypeStruct((n_tiles, Cout, 1), jnp.float32),
        ),
        compiler_params=pltpu.CompilerParams(
            dimension_semantics=("parallel",),
            vmem_limit_bytes=32 * 1024 * 1024),
        cost_estimate=cost1,
    )(p_t, w_t)

    # ---- BN finalize: O(Cout) scalar glue (global mean / biased variance) --
    s = jnp.sum(psum[:, :, 0], axis=0)
    ss = jnp.sum(pssq[:, :, 0], axis=0)
    mean = s / M
    var = ss / M - mean * mean
    scale = gamma.astype(jnp.float32) * lax.rsqrt(var + BN_EPS)
    shift = beta.astype(jnp.float32) - mean * scale
    scale2 = scale.reshape(Cout, 1)
    shift2 = shift.reshape(Cout, 1)

    # ---- pass 2: lane-dense fused BN affine + activation --------------------
    tile_m2 = _pick_tile(M, 8192)
    n_tiles2 = M // tile_m2
    cost2 = pl.CostEstimate(
        flops=3 * Cout * M,
        transcendentals=Cout * M if activation == "sigmoid" else 0,
        bytes_accessed=2 * Cout * M * 4 + 2 * Cout * 4)
    out_t = pl.pallas_call(
        functools.partial(_bn_act_kernel, activation=activation),
        grid=(n_tiles2,),
        in_specs=[
            pl.BlockSpec((Cout, tile_m2), lambda i: (0, i)),
            pl.BlockSpec((Cout, 1), lambda i: (0, 0)),
            pl.BlockSpec((Cout, 1), lambda i: (0, 0)),
        ],
        out_specs=pl.BlockSpec((Cout, tile_m2), lambda i: (0, i)),
        out_shape=jax.ShapeDtypeStruct((Cout, M), jnp.float32),
        compiler_params=pltpu.CompilerParams(
            dimension_semantics=("parallel",),
            vmem_limit_bytes=32 * 1024 * 1024),
        cost_estimate=cost2,
    )(conv_t, scale2, shift2)

    # ---- wrapper glue: back to NCDHW ----------------------------------------
    return jnp.transpose(out_t.reshape(Cout, N, D, H, W), (1, 0, 2, 3, 4))


def reference_forward(x_ncdhw, w_oidhw, gamma, beta, activation="relu"):
    """Pure-JAX reference (inputs rounded to bf16 to match the MXU precision)."""
    xb = x_ncdhw.astype(jnp.bfloat16).astype(jnp.float32)
    wb = w_oidhw.astype(jnp.bfloat16).astype(jnp.float32)
    y = lax.conv_general_dilated(
        xb, wb, window_strides=(1, 1, 1), padding=[(1, 1)] * 3,
        dimension_numbers=("NCDHW", "OIDHW", "NCDHW"))
    mean = jnp.mean(y, axis=(0, 2, 3, 4), keepdims=True)
    var = jnp.mean((y - mean) ** 2, axis=(0, 2, 3, 4), keepdims=True)
    y = (y - mean) * lax.rsqrt(var + BN_EPS)
    y = y * gamma.reshape(1, -1, 1, 1, 1) + beta.reshape(1, -1, 1, 1, 1)
    if activation == "relu":
        y = jnp.maximum(y, 0.0)
    elif activation == "sigmoid":
        y = jax.nn.sigmoid(y)
    return y


if __name__ == "__main__":
    # Small shapes: batch=2, in_channel=out_channels=4, spatial D=H=W=8.
    N, C, D, H, W = 2, 4, 8, 8, 8

    key = jax.random.PRNGKey(0)
    kx, kw, kg, kb = jax.random.split(key, 4)
    x = jax.random.normal(kx, (N, C, D, H, W), jnp.float32)
    w = jax.random.normal(kw, (C, C, KSZ, KSZ, KSZ), jnp.float32) * 0.1
    gamma = jax.random.normal(kg, (C,), jnp.float32) * 0.5 + 1.0   # BN weight
    beta = jax.random.normal(kb, (C,), jnp.float32) * 0.1          # BN bias

    # conv1 of ResidualAttentionBlock: Conv3d + BN + ReLU
    out_relu = jax.block_until_ready(conv3d_bn_act_forward(x, w, gamma, beta, "relu"))
    ref_relu = jax.block_until_ready(reference_forward(x, w, gamma, beta, "relu"))
    assert out_relu.shape == ref_relu.shape == (N, C, D, H, W)
    err = float(jnp.max(jnp.abs(out_relu - ref_relu)))
    assert jnp.allclose(out_relu, ref_relu, atol=1e-2, rtol=1e-2), err

    # conv2 of ResidualAttentionBlock: same block without activation
    out_lin = jax.block_until_ready(conv3d_bn_act_forward(x, w, gamma, beta, "none"))
    ref_lin = jax.block_until_ready(reference_forward(x, w, gamma, beta, "none"))
    err2 = float(jnp.max(jnp.abs(out_lin - ref_lin)))
    assert jnp.allclose(out_lin, ref_lin, atol=1e-2, rtol=1e-2), err2

    print("KERNEL_OK")
</pallas_src>

<mosaic_0001>
module attributes {stable_mosaic.version = 11 : i64} {
  func.func @_conv_stats_kernel(%arg0: i32, %arg1: memref<108x512xbf16, #tpu.memory_space<vmem>>, %arg2: memref<4x108xbf16, #tpu.memory_space<vmem>>, %arg3: memref<4x512xf32, #tpu.memory_space<vmem>>, %arg4: memref<1x4x1xf32, #tpu.memory_space<vmem>>, %arg5: memref<1x4x1xf32, #tpu.memory_space<vmem>>) attributes {dimension_semantics = [#tpu.dimension_semantics<parallel>], iteration_bounds = array<i64: 2>, scalar_prefetch = 0 : i64, scratch_operands = 0 : i64, tpu.core_type = #tpu.core_type<tc>, window_params = [{transform_indices = @transform_0, window_bounds = array<i64: 108, 512>}, {pipeline_mode = #tpu.pipeline_mode<synchronous>, transform_indices = @transform_1, window_bounds = array<i64: 4, 108>}, {transform_indices = @transform_2, window_bounds = array<i64: 4, 512>}, {transform_indices = @transform_3, window_bounds = array<i64: 1, 4, 1>}, {transform_indices = @transform_4, window_bounds = array<i64: 1, 4, 1>}]} {
    %c0 = arith.constant 0 : index
    %c0_0 = arith.constant 0 : index
    %0 = vector.load %arg2[%c0, %c0_0] : memref<4x108xbf16, #tpu.memory_space<vmem>>, vector<4x108xbf16>
    %c0_1 = arith.constant 0 : index
    %c0_2 = arith.constant 0 : index
    %1 = vector.load %arg1[%c0_1, %c0_2] : memref<108x512xbf16, #tpu.memory_space<vmem>>, vector<108x512xbf16>
    %cst = arith.constant dense<0.000000e+00> : vector<4x512xf32>
    %2 = tpu.matmul %0, %1, %cst {dimension_numbers = #tpu.dot_dimension_numbers<[1], [0], [0], [1], [0, 0, 1, 1], [], []>} : vector<4x108xbf16>, vector<108x512xbf16>, vector<4x512xf32> -> vector<4x512xf32>
    %c0_3 = arith.constant 0 : index
    %c0_4 = arith.constant 0 : index
    %3 = vector.load %arg3[%c0_3, %c0_4] : memref<4x512xf32, #tpu.memory_space<vmem>>, vector<4x512xf32>
    tpu.vector_store %arg3[%c0_3, %c0_4], %2 {strides = array<i32>} : memref<4x512xf32, #tpu.memory_space<vmem>>, vector<4x512xf32>,
    %cst_5 = arith.constant dense<0.000000e+00> : vector<4xf32>
    %4 = vector.multi_reduction <add>, %2, %cst_5 [1] : vector<4x512xf32> to vector<4xf32>
    %5 = vector.shape_cast %4 : vector<4xf32> to vector<4x1xf32>
    %c0_6 = arith.constant 0 : index
    %c0_7 = arith.constant 0 : index
    %c0_8 = arith.constant 0 : index
    %6 = vector.load %arg4[%c0_6, %c0_7, %c0_8] : memref<1x4x1xf32, #tpu.memory_space<vmem>>, vector<1x4x1xf32>
    %7 = vector.shape_cast %6 : vector<1x4x1xf32> to vector<4x1xf32>
    %8 = vector.shape_cast %5 : vector<4x1xf32> to vector<1x4x1xf32>
    tpu.vector_store %arg4[%c0_6, %c0_7, %c0_8], %8 {strides = array<i32>} : memref<1x4x1xf32, #tpu.memory_space<vmem>>, vector<1x4x1xf32>,
    %9 = arith.mulf %2, %2 : vector<4x512xf32>
    %cst_9 = arith.constant dense<0.000000e+00> : vector<4xf32>
    %10 = vector.multi_reduction <add>, %9, %cst_9 [1] : vector<4x512xf32> to vector<4xf32>
    %11 = vector.shape_cast %10 : vector<4xf32> to vector<4x1xf32>
    %c0_10 = arith.constant 0 : index
    %c0_11 = arith.constant 0 : index
    %c0_12 = arith.constant 0 : index
    %12 = vector.load %arg5[%c0_10, %c0_11, %c0_12] : memref<1x4x1xf32, #tpu.memory_space<vmem>>, vector<1x4x1xf32>
    %13 = vector.shape_cast %12 : vector<1x4x1xf32> to vector<4x1xf32>
    %14 = vector.shape_cast %11 : vector<4x1xf32> to vector<1x4x1xf32>
    tpu.vector_store %arg5[%c0_10, %c0_11, %c0_12], %14 {strides = array<i32>} : memref<1x4x1xf32, #tpu.memory_space<vmem>>, vector<1x4x1xf32>,
    return
  }
  func.func @transform_0(%arg0: i32) -> (i32, i32) {
    %c0_i32 = arith.constant 0 : i32
    %c0_i32_0 = arith.constant 0 : i32
    return %c0_i32, %arg0 : i32, i32
  }
  func.func @transform_1(%arg0: i32) -> (i32, i32) {
    %c0_i32 = arith.constant 0 : i32
    %c0_i32_0 = arith.constant 0 : i32
    %c0_i32_1 = arith.constant 0 : i32
    return %c0_i32, %c0_i32_0 : i32, i32
  }
  func.func @transform_2(%arg0: i32) -> (i32, i32) {
    %c0_i32 = arith.constant 0 : i32
    %c0_i32_0 = arith.constant 0 : i32
    return %c0_i32, %arg0 : i32, i32
  }
  func.func @transform_3(%arg0: i32) -> (i32, i32, i32) {
    %c0_i32 = arith.constant 0 : i32
    %c0_i32_0 = arith.constant 0 : i32
    %c0_i32_1 = arith.constant 0 : i32
    return %arg0, %c0_i32, %c0_i32_0 : i32, i32, i32
  }
  func.func @transform_4(%arg0: i32) -> (i32, i32, i32) {
    %c0_i32 = arith.constant 0 : i32
    %c0_i32_0 = arith.constant 0 : i32
    %c0_i32_1 = arith.constant 0 : i32
    return %arg0, %c0_i32, %c0_i32_0 : i32, i32, i32
  }
}

</mosaic_0001>

<bundles_post_ra>
// kernel: tpu_custom_call.1
= control target key start
LH: loop header
LB: loop body
LE: loop exit
PB: predicated region body
PF: predicated region fallthrough
CT: control target
= control target key end

     0   :  { %10 = vsyncpa [#allocation3], 0  ;;  %s1235_s0 = inlined_call_operand.hbm [shape: bf16[108,1024], index: 0, kind: input, shape index: {}]   ;;  %s1236_s1 = inlined_call_operand.hbm [shape: bf16[4,108], index: 1, kind: input, shape index: {}]   ;;  %s1237_s2 = inlined_call_operand.hbm [shape: f32[4,1024], index: 2, kind: output, shape index: {0}]   ;;  %s1238_s3 = inlined_call_operand.vmem [shape: f32[2,4,1], index: 3, kind: output, shape index: {1}]   ;;  %s1239_s4 = inlined_call_operand.vmem [shape: f32[2,4,1], index: 4, kind: output, shape index: {2}]  }
   0x1   :  { %12 = vsyncpa [#allocation3 + $0x1], 0 }
   0x2   :  { %13 = vsyncpa [#allocation6], 0 }
   0x3   :  { %14 = vsyncpa [#allocation4], 0 }
   0x4   :  { %16 = vsyncpa [#allocation4 + $0x1], 0  ;;  %s1021_s15 = smov 0   ;;  %s1023_s16 = smov 0  }
   0x5   :  { %s1025_s17 = smov 0   ;;  %s1027_s18 = smov 0  }
   0x6 LB: > { %s1042_s19 = sadd.s32 4294967295, %s987_s18   ;;  %s710_s20 = sadd.s32 4294967294, %s987_s18   ;;  %s987_s18 = sphi %s1027_s18, %s1262_s18   ;;  %s983_s17 = sphi %s1025_s17, %s1261_s17   ;;  %s979_s16 = sphi %s1023_s16, %s1260_s16   ;;  %s975_s15 = sphi %s1021_s15, %s1259_s15  }
   0x7   : > { %s1046_s21 = sadd.s32 1, %s987_s18   ;;  %s29_s22 = sadd.s32 1, %s983_s17 }
   0x8   : > { %s26_s23 = ssub.s32 %s987_s18, %s1046_s21  ;;  %p36_p0 = scmp.ne.s32.totalorder %s983_s17, %s979_s16 }
   0x9   : > { %p27_p1 = scmp.eq.s32.totalorder %s26_s23, 0  ;;  %p37_p2 = scmp.eq.s32.totalorder %s987_s18, 0 }
   0xa   : > { %p42_p3 = scmp.ne.s32.totalorder %s979_s16, %s975_s15  ;;  %p1240_p4 = scmp.eq.s32.totalorder %s1042_s19, 0 }
   0xb   : > { %s1058_s24 = scalar_select %p27_p1, %s983_s17, %s29_s22  }
   0xc   : > { %p1060_p5 = por %p37_p2, %p36_p0  ;;  %p1066_p6 = por %p1240_p4, %p42_p3 }
   0xd   : > { %p87_p7 = scmp.eq.s32.totalorder %s1042_s19, 1  ;;  %p93_p8 = scmp.eq.s32.totalorder %s710_s20, 1 }
   0xe   : > { %s1245_s26 = scalar_select %p1066_p6, 1, 0 }
   0xf   : > { %p711_p9 = scmp.ge.s32.totalorder %s987_s18, 1  ;;  %p152_p10 = scmp.lt.s32.totalorder %s987_s18, 3 }
  0x10   : > { %p1073_p11 = por %p87_p7, %p36_p0  ;;  %p1077_p12 = por %p93_p8, %p42_p3 }
  0x11   : > { %p1081_p13 = pnand %p711_p9, %p152_p10  ;;  %s989_s30 = smov [#allocation5]  }
  0x12   : > { %s1246_s27 = scalar_select %p1073_p11, 1, 0 }
  0x13   : > { %s1247_s28 = scalar_select %p1077_p12, 1, 0 }
  0x14   : > { %s1248_s29 = scalar_select %p1081_p13, 1, 0 }
  0x15   : > { %p770_p2 = pneg %p1081_p13  ;;  %s165_s5 = sshll.u32 %s989_s30, 4  ;;  %s166_s5 = int_to_ptr.vmem [resolvable:$true] %s165_s5 }
  0x16   : > { %p783_p4 = scmp.lt.s32.totalorder %s987_s18, 2  ;;  %p1249_p0 = scmp.eq.s32.totalorder %s1042_s19, 0 }
  0x17   : > { %s176_s7 = sand.u32 1, %s983_s17   ;;  %s876_s10 = scalar_lea.vmem %s166_s5, 32 }
  0x18   : > { %p1091_p7 = pnand %p770_p2, %p1249_p0  ;;  %p1098_p3 = pnand %p783_p4, %p1060_p5 }
  0x19   : > { %s760_s9 = smul.u32 224, %s176_s7  ;;  %p877_p9 = scmp.ne.s32.totalorder %s166_s5, %s876_s10 }
  0x1a   : > { %p867_p8 = pneg %p1091_p7  ;;  %p884_p12 = scmp.lt.s32.totalorder %s166_s5, %s166_s5 }
  0x1b   : > { %p885_p11 = scmp.lt.s32.totalorder %s876_s10, %s876_s10 }
  0x1c   : > { %p879_p10 = pnand %p877_p9, %p867_p8 }
  0x1d   : > { %p886_p2 = por %p885_p11, %p884_p12 }
  0x1e   : > { %p880_p1 = pneg %p879_p10 }
  0x20   : > { %p887_p0 = pnand %p886_p2, %p880_p1 }
  0x22   : > { %890 = shalt.err (!%p887_p0)
}
  0x23   : > { %773 = dma.hbm_to_vmem [thread:$0]  (!%p1091_p7), %s1236_s1, 32, %s166_s5, [#allocation6]  }
  0x24   : > { %s758_s13 = sshll.u32 %s987_s18, 8  ;;  %s180_s14 = scalar_lea.vmem [#allocation2], %s760_s9 }
  0x25   : > { %s187_s20 = sshll.u32 %s180_s14, 4  ;;  %s1113_s25 = scalar_lea.hbm %s1235_s0, %s758_s13  ;;  %s1115_s20 = int_to_ptr.vmem [resolvable:$true] %s187_s20 }
  0x26   : > { %s1117_s30 = scalar_lea.sflag [#allocation3], %s176_s7  ;;  %s891_s6 = scalar_lea.hbm %s1113_s25, 3584 }
  0x27   : > { %p892_p4 = scmp.ne.s32.totalorder %s1113_s25, %s891_s6  ;;  %p893_p5 = pneg %p1098_p3 }
  0x28   : > { %s896_s10 = scalar_lea.hbm %s1235_s0, 7168  ;;  %p897_p1 = scmp.lt.s32.totalorder %s1113_s25, %s1235_s0 }
  0x29   : > { %p894_p11 = pnand %p893_p5, %p892_p4  ;;  %p898_p7 = scmp.lt.s32.totalorder %s896_s10, %s891_s6 }
  0x2b   : > { %p895_p12 = pneg %p894_p11  ;;  %p899_p8 = por %p898_p7, %p897_p1 }
  0x2d   : > { %p900_p9 = pnand %p899_p8, %p895_p12 }
  0x2f   : > { %903 = shalt.err (!%p900_p9)
}
  0x30   : > { %s904_s7 = scalar_lea.vmem %s1115_s20, 3584  ;;  %s990_s13 = smov [#allocation2]  }
  0x31   : > { %p905_p10 = scmp.ne.s32.totalorder %s1115_s20, %s904_s7  ;;  %s909_s14 = sshll.u32 %s990_s13, 4  ;;  %s910_s14 = int_to_ptr.vmem [resolvable:$false] %s909_s14 }
  0x32   : > { %s911_s22 = scalar_lea.vmem %s910_s14, 7168  ;;  %p912_p4 = scmp.lt.s32.totalorder %s1115_s20, %s910_s14 }
  0x33   : > { %p907_p2 = pnand %p905_p10, %p893_p5  ;;  %p913_p11 = scmp.lt.s32.totalorder %s911_s22, %s904_s7 }
  0x35   : > { %p908_p0 = pneg %p907_p2  ;;  %p914_p6 = por %p913_p11, %p912_p4 }
  0x37   : > { %p915_p13 = pnand %p914_p6, %p908_p0 }
  0x39   : > { %918 = shalt.err (!%p915_p13)
}
  0x3a   : > { %s991_s23 = smov 512   ;;  %s992_s6 = smov 256  }
  0x3b   : > { %s993_s5 = smov 16   ;;  %p1252_p5 = scmp.ne.s32.totalorder %s1248_s29, 0 }
  0x3c   : > { %777 = dma.hbm_to_vmem [thread:$0]  (!%p1098_p3), %s1113_s25, 3584, %s1115_s20, %s1117_s30, %s991_s23, %s992_s6, %s993_s5  }
  0x3d   : > { %199 = sbr.rel (%p1252_p5) target bundleno = 446 (0x1be), region = 28  ;;  %s1141_s9 = sand.u32 (!%p1252_p5), 1, %s979_s16  }
  0x3e   : > { %s761_s10 = smul.u32 (!%p1252_p5), 224, %s1141_s9  ;;  %s202_s11 = scalar_lea.sflag (!%p1252_p5), [#allocation3], %s1141_s9 }
  0x3f   : > { %p1253_p6 = scmp.ne.s32.totalorder (!%p1252_p5), %s1245_s26, 0 }
  0x40   : > { %s1145_s12 = scalar_lea.vmem (!%p1252_p5), [#allocation2], %s761_s10 }
  0x42   : > { %962 = dma.done.wait (%p1253_p6), %s202_s11, 3584  }
  0x43   : > { %964 = vsyncadd (%p1253_p6), %s202_s11, 4294963712  ;;  %p1254_p13 = scmp.eq.s32.totalorder %s1042_s19, 0 }
  0x45   : > { %966 = dma.done.wait (%p1254_p13), [#allocation6], 32   ;;  %p1255_p3 = pmov %p1254_p13 }
  0x46   : > { %v994_v0 = vmov 0   ;;  %vm422_vm0 = vcmask 1045504   ;;  %v823_v1 = vld [vmem:[%s1145_s12 + $0xc4] ss:$16 sps:$4 sm:$0x3f]   ;;  %vm418_vm1 = vcmask 883712  }
  0x47   : > { %968 = vsyncadd (%p1255_p3), [#allocation6], 4294967264  ;;  %467 = vmatprep.mubr.bf16.mxu0 %v994_v0  ;;  %508 = vmatprep.mubr.bf16.mxu1 %v994_v0  ;;  %v825_v2 = vld [vmem:[%s1145_s12 + $0xcc] ss:$16 sps:$4 sm:$0x3f]   ;;  %vm527_vm2 = vcmask 1043456  }
  0x48   : > { %749 = vmatprep.subr.msk.bf16.mxu0 %vm422_vm0, %v823_v1  ;;  %v827_v3 = vld [vmem:[%s1145_s12 + $0xc0] ss:$16 sps:$4 sm:$0x3f]   ;;  %v828_v4 = vld [vmem:[%s1145_s12 + $0xc8] ss:$16 sps:$4 sm:$0x3f]   ;;  %751 = vmatprep.subr.msk.bf16.mxu1 %vm422_vm0, %v825_v2 }
  0x49   : > { %v829_v5 = vld [vmem:[%s1145_s12 + $0xa4] ss:$16 sps:$4 sm:$0xff]   ;;  %v424_v6 = vsel %vm422_vm0, %v827_v3, 0  ;;  %v430_v7 = vsel %vm422_vm0, %v828_v4, 0  ;;  %v831_v8 = vld [vmem:[%s1145_s12 + $0xac] ss:$16 sps:$4 sm:$0xff]  }
  0x4a   : > { %438 = vmatpush1.bf16.msra.mxu0 %v424_v6  ;;  %479 = vmatpush1.bf16.msra.mxu1 %v430_v7  ;;  %v833_v9 = vld [vmem:[%s1145_s12 + $0xa0] ss:$16 sps:$4 sm:$0xff]   ;;  %v834_v10 = vld [vmem:[%s1145_s12 + $0xa8] ss:$16 sps:$4 sm:$0xff]   ;;  %v835_v11 = vld [vmem:[%s1145_s12 + $0x84] ss:$16 sps:$4 sm:$0xff]  }
  0x4b   : > { %439 = vmatprep.subr.bf16.mxu0 %v829_v5  ;;  %480 = vmatprep.subr.bf16.mxu1 %v831_v8  ;;  %v837_v12 = vld [vmem:[%s1145_s12 + $0x8c] ss:$16 sps:$4 sm:$0xff]   ;;  %v839_v13 = vld [vmem:[%s1145_s12 + $0x80] ss:$16 sps:$4 sm:$0xff]   ;;  %v840_v14 = vld [vmem:[%s1145_s12 + $0x88] ss:$16 sps:$4 sm:$0xff]  }
  0x4c   : > { %v841_v15 = vld [vmem:[%s1145_s12 + $0x64] ss:$16 sps:$4 sm:$0xff]   ;;  %v843_v16 = vld [vmem:[%s1145_s12 + $0x6c] ss:$16 sps:$4 sm:$0xff]   ;;  %v845_v17 = vld [vmem:[%s1145_s12 + $0x60] ss:$16 sps:$4 sm:$0xff]  }
  0x4d   : > { %v846_v18 = vld [vmem:[%s1145_s12 + $0x68] ss:$16 sps:$4 sm:$0xff]   ;;  %v847_v19 = vld [vmem:[%s1145_s12 + $0x44] ss:$16 sps:$4 sm:$0xff]   ;;  %v849_v20 = vld [vmem:[%s1145_s12 + $0x4c] ss:$16 sps:$4 sm:$0xff]  }
  0x4e   : > { %440 = vmatpush1.bf16.msra.mxu0 %v833_v9  ;;  %481 = vmatpush1.bf16.msra.mxu1 %v834_v10  ;;  %v851_v21 = vld [vmem:[%s1145_s12 + $0x40] ss:$16 sps:$4 sm:$0xff]   ;;  %v852_v22 = vld [vmem:[%s1145_s12 + $0x48] ss:$16 sps:$4 sm:$0xff]   ;;  %v853_v23 = vld [vmem:[%s1145_s12 + $0x24] ss:$16 sps:$4 sm:$0xff]  }
  0x4f   : > { %441 = vmatprep.subr.bf16.mxu0 %v835_v11  ;;  %482 = vmatprep.subr.bf16.mxu1 %v837_v12  ;;  %v855_v24 = vld [vmem:[%s1145_s12 + $0x2c] ss:$16 sps:$4 sm:$0xff]   ;;  %v857_v25 = vld [vmem:[%s1145_s12 + $0x20] ss:$16 sps:$4 sm:$0xff]   ;;  %v858_v26 = vld [vmem:[%s1145_s12 + $0x28] ss:$16 sps:$4 sm:$0xff]  }
  0x50   : > { %v859_v27 = vld [vmem:[%s1145_s12 + $0x4] ss:$16 sps:$4 sm:$0xff]   ;;  %v861_v28 = vld [vmem:[%s1145_s12 + $0xc] ss:$16 sps:$4 sm:$0xff]   ;;  %v863_v29 = vld [vmem:[%s1145_s12] ss:$16 sps:$4 sm:$0xff]  }
  0x51   : > { %v864_v30 = vld [vmem:[%s1145_s12 + $0x8] ss:$16 sps:$4 sm:$0xff]   ;;  %v253_v31 = vld [vmem:[#allocation5] sm:$0x3]  ;;  %s718_s26 = sshll.u32 %s1141_s9, 4  ;;  %s759_s8 = sshll.u32 %s1042_s19, 8 }
  0x52   : > { %442 = vmatpush1.bf16.msra.mxu0 %v839_v13  ;;  %483 = vmatpush1.bf16.msra.mxu1 %v840_v14  ;;  %s229_s29 = scalar_lea.vmem [#allocation7], %s718_s26  ;;  %s574_s7 = scalar_lea.hbm %s1237_s2, %s759_s8 }
  0x53   : > { %443 = vmatprep.subr.bf16.mxu0 %v841_v15  ;;  %484 = vmatprep.subr.bf16.mxu1 %v843_v16  ;;  %s576_s20 = sshll.u32 %s229_s29, 4  ;;  %s554_s13 = scalar_lea.sflag [#allocation4], %s1141_s9  ;;  %s577_s20 = int_to_ptr.vmem [resolvable:$true] %s576_s20 }
  0x54   : > { %s919_s14 = scalar_lea.vmem %s577_s20, 256  ;;  %p1256_p1 = scmp.ne.s32.totalorder %s1246_s27, 0 }
  0x55   : > { %p920_p12 = scmp.ne.s32.totalorder %s577_s20, %s919_s14  ;;  %s995_s22 = smov [#allocation7]  }
  0x56   : > { %444 = vmatpush1.bf16.msra.mxu0 %v845_v17  ;;  %485 = vmatpush1.bf16.msra.mxu1 %v846_v18  ;;  %s923_s23 = sshll.u32 %s995_s22, 4  ;;  %s924_s23 = int_to_ptr.vmem [resolvable:$false] %s923_s23 }
  0x57   : > { %445 = vmatprep.subr.bf16.mxu0 %v847_v19  ;;  %486 = vmatprep.subr.bf16.mxu1 %v849_v20  ;;  %p921_p7 = pnand %p920_p12, %p1256_p1  ;;  %s925_s6 = scalar_lea.vmem %s924_s23, 512 }
  0x58   : > { %p926_p9 = scmp.lt.s32.totalorder %s577_s20, %s924_s23  ;;  %p927_p10 = scmp.lt.s32.totalorder %s925_s6, %s919_s14 }
  0x59   : > { %p922_p8 = pneg %p921_p7 }
  0x5a   : > { %446 = vmatpush1.bf16.msra.mxu0 %v851_v21  ;;  %487 = vmatpush1.bf16.msra.mxu1 %v852_v22  ;;  %p928_p2 = por %p927_p10, %p926_p9 }
  0x5b   : > { %447 = vmatprep.subr.bf16.mxu0 %v853_v23  ;;  %488 = vmatprep.subr.bf16.mxu1 %v855_v24 }
  0x5c   : > { %p929_p0 = pnand %p928_p2, %p922_p8 }
  0x5e   : > { %448 = vmatpush1.bf16.msra.mxu0 %v857_v25  ;;  %489 = vmatpush1.bf16.msra.mxu1 %v858_v26 }
  0x5f   : > { %449 = vmatprep.subr.bf16.mxu0 %v859_v27  ;;  %490 = vmatprep.subr.bf16.mxu1 %v861_v28 }
  0x62   : > { %450 = vmatpush1.bf16.msra.mxu0 %v863_v29  ;;  %491 = vmatpush1.bf16.msra.mxu1 %v864_v30 }
  0x65   : > { %750 = vmatmul.mubr.msk.bf16.vlgmr.msra.gmra.mxu0 %vm418_vm1, %v253_v31  ;;  %752 = vmatmul.mubr.msk.bf16.vlgmr.msra.gmra.mxu1 %vm418_vm1, %v253_v31 }
 0x125   : > { %v469_v32 = vpop.f32.mrf.mxu0  ;;  %v510_v33 = vpop.f32.mrf.mxu1 }
 0x126   : > { %v539_v34 = vmul.f32 %v469_v32, %v469_v32  ;;  %v541_v35 = vmul.f32 %v510_v33, %v510_v33  ;;  %v528_v36 = vsel %vm527_vm2, %v469_v32, 0.0  ;;  %v531_v42 = vsel %vm527_vm2, %v510_v33, 0.0 }
 0x127   : > { %v471_v37 = vpop.f32.mrf.mxu0  ;;  %v512_v38 = vpop.f32.mrf.mxu1 }
 0x128   : > { %v521_v39 = vcombine.low %v469_v32, %v471_v37  ;;  %v529_v40 = vsel %vm527_vm2, %v471_v37, 0.0  ;;  %v540_v41 = vmul.f32 %v471_v37, %v471_v37  ;;  %v522_v43 = vcombine.low %v510_v33, %v512_v38 }
 0x129   : > { %v473_v44 = vpop.f32.mrf.mxu0  ;;  %v514_v45 = vpop.f32.mrf.mxu1  ;;  %v530_v46 = vadd.f32 %v529_v40, %v528_v36  ;;  %v543_v47 = vsel %vm527_vm2, %v539_v34, 0.0  ;;  %v546_v49 = vsel %vm527_vm2, %v541_v35, 0.0  ;;  %v542_v54 = vmul.f32 %v512_v38, %v512_v38 }
 0x12a   : > { %525 = vst [vmem:[%s229_s29] sm:$0xff] %v521_v39  ;;  %v544_v48 = vsel %vm527_vm2, %v540_v41, 0.0  ;;  %526 = vst [vmem:[%s229_s29 + $0x8] sm:$0xff] %v522_v43  ;;  %v533_v55 = vsel %vm527_vm2, %v512_v38, 0.0 }
 0x12b   : > { %v474_v50 = vpop.f32.mrf.mxu0  ;;  %v515_v51 = vpop.f32.mrf.mxu1  ;;  %v532_v52 = vadd.f32 %v531_v42, %v530_v46  ;;  %v545_v53 = vadd.f32 %v544_v48, %v543_v47  ;;  %v548_v58 = vsel %vm527_vm2, %v542_v54, 0.0 }
 0x12d   : > { %v534_v56 = vadd.f32 %v533_v55, %v532_v52  ;;  %v547_v57 = vadd.f32 %v546_v49, %v545_v53 }
 0x12f   : > { %535 = vadd.xlane.f32.xlu0 %v534_v56  ;;  %v549_v59 = vadd.f32 %v548_v58, %v547_v57 }
 0x133   : > { %550 = vadd.xlane.f32.xlu0 %v549_v59 }
 0x134   : > { %932 = shalt.err (!%p929_p0)
}
 0x135   : > { %s933_s5 = scalar_lea.hbm %s574_s7, 256  ;;  %s937_s11 = scalar_lea.hbm %s1237_s2, 512 }
 0x136   : > { %p934_p4 = scmp.ne.s32.totalorder %s574_s7, %s933_s5  ;;  %p938_p6 = scmp.lt.s32.totalorder %s574_s7, %s1237_s2 }
 0x137   : > { %p939_p13 = scmp.lt.s32.totalorder %s937_s11, %s933_s5 }
 0x138   : > { %p935_p11 = pnand %p934_p4, %p1256_p1 }
 0x139   : > { %p940_p3 = por %p939_p13, %p938_p6 }
 0x13a   : > { %p936_p5 = pneg %p935_p11 }
 0x13c   : > { %p941_p12 = pnand %p940_p3, %p936_p5 }
 0x13e   : > { %944 = shalt.err (!%p941_p12)
}
 0x13f   : > { %768 = dma.vmem_to_hbm [thread:$0]  (%p1256_p1), %s577_s20, 256, %s574_s7, %s554_s13   ;;  %vm537_vm3 = vcmask 3072  }
 0x140   : > { %p244_p7 = scmp.lt.s32.totalorder %s1042_s19, 1 }
 0x142   : > { %s1264_s19 = smov (!%p244_p7, %s1042_s19), 1 }
 0x143   : > { %s719_s29 = sshll.u32 %s1264_s19, 2 }
 0x144   : > { %s247_s30 = scalar_lea.vmem %s1238_s3, %s719_s29  ;;  %s251_s23 = scalar_lea.vmem %s1239_s4, %s719_s29 }
 0x1b8   : > { %v536_v60 = vpop.xlane.xlu0 %535 }
 0x1b9   : > { %538 = vst.msk [vmem:[%s247_s30] sm:$0xf] %vm537_vm3, %v536_v60 }
 0x1bc   : > { %v551_v61 = vpop.xlane.xlu0 %550 }
 0x1bd   : > { %552 = vst.msk [vmem:[%s251_s23] sm:$0xf] %vm537_vm3, %v551_v61 }
 0x1be PF: > { %s594_s27 = sand.u32 1, %s975_s15   ;;  %p1257_p1 = scmp.ne.s32.totalorder %s1247_s28, 0 }
 0x1bf   : > { %p1258_p8 = scmp.ge.s32.totalorder %s987_s18, 2  ;;  %s595_s19 = scalar_lea.sflag [#allocation4], %s594_s27 }
 0x1c1   : > { %p779_p9 = pnand %p1258_p8, %p1257_p1 }
 0x1c3   : > { %p780_p10 = pneg %p779_p9 }
 0x1c5   : > { %970 = dma.done.wait (%p780_p10), %s595_s19, 256  }
 0x1c6   : > { %972 = vsyncadd (%p780_p10), %s595_s19, 4294967040  ;;  %p19_p2 = scmp.ge.s32.totalorder %s1046_s21, 4   ;;  %s1259_s15 = smov %s979_s16 }
 0x1c7   : > { %s1260_s16 = smov %s983_s17  ;;  %s1261_s17 = smov %s1058_s24 }
 0x1c8   : > { %s1262_s18 = smov %s1046_s21  ;;  %21 = sbr.rel (!%p19_p2) target bundleno = 6 (0x6), region = 101 }
 0x1cd   :  { %614 = vsyncpa [#allocation3], 1 }
 0x1ce   :  { %616 = vsyncpa [#allocation3 + $0x1], 1 }
 0x1cf   :  { %617 = vsyncpa [#allocation6], 1 }
 0x1d0   :  { %618 = vsyncpa [#allocation4], 1 }
 0x1d1   :  { %620 = vsyncpa [#allocation4 + $0x1], 1 }

</bundles_post_ra>
